<compile_context>
chip_gen: v6e
topology: v6e:2x2x1
jax: 0.10.0
libtpu: 0.0.40
codegen_flags: <defaults>
</compile_context>

<pallas_src>
import functools
from typing import NamedTuple, Tuple

import numpy as np
import jax
import jax.numpy as jnp
from jax.experimental import pallas as pl
from jax.experimental.pallas import tpu as pltpu

LN_EPS = 1e-5  # PyTorch nn.LayerNorm default


def _round_up(x, m):
    return ((x + m - 1) // m) * m


class Layout(NamedTuple):
    S: int                 # state_dim
    A: int                 # action_dim
    H: int                 # true hidden_dim
    HP: int                # hidden_dim padded to 128 lanes
    OW: int                # fused output width (>= S+1, multiple of 128)
    AR: int                # row offset of the action part inside weight block 0
    R: Tuple[int, ...]     # row offsets of weight blocks 0..6
    WR: int                # total rows of the weight slab
    VR: int                # total rows of the bias/LN slab


# ----------------------------------------------------------------------------
# Pallas kernel: full forward (dynamics_net + reward_net) for one batch tile.
# ----------------------------------------------------------------------------
def _dynamics_kernel(state_ref, action_ref, w_ref, v_ref, out_ref, *, L: Layout):
    S, A, H, HP, OW, R = L.S, L.A, L.H, L.HP, L.OW, L.R
    f32 = jnp.float32

    state = state_ref[...]                       # [TB, S]
    action = action_ref[...]                     # [TB, A]

    # Fused first Linear of dynamics_net (lanes [0,HP)) and reward_net
    # (lanes [HP,2HP)).  x = [state|action] is never materialized: the shared
    # matmul is split over the state / action rows of weight block 0.
    t = (jnp.dot(state, w_ref[pl.ds(0, S), :], preferred_element_type=f32)
         + jnp.dot(action, w_ref[pl.ds(L.AR, A), :], preferred_element_type=f32)
         + v_ref[pl.ds(0, 1), :])                # [TB, 2*HP]

    h = t[:, :HP]                                # dynamics branch (pre-LayerNorm)
    r = t[:, HP:]                                # reward branch   (pre-ReLU)

    inv_h = 1.0 / H                              # LN stats over the TRUE hidden_dim

    def layernorm_relu(hx, layer):
        # One-pass variance.  Padded lanes of hx are exactly 0, so sums over the
        # HP lanes equal sums over the true H lanes.
        s1 = jnp.sum(hx, axis=-1, keepdims=True)
        s2 = jnp.sum(hx * hx, axis=-1, keepdims=True)
        mu = s1 * inv_h
        var = s2 * inv_h - mu * mu
        hn = (hx - mu) * jax.lax.rsqrt(var + LN_EPS)
        gamma = v_ref[pl.ds(6 + layer, 1), pl.ds(0, HP)]    # zero on padded lanes
        beta = v_ref[pl.ds(11 + layer, 1), pl.ds(0, HP)]    # zero on padded lanes
        return jnp.maximum(hn * gamma + beta, 0.0)          # padded lanes -> 0 again

    # dynamics_net: 5 x (Linear -> LayerNorm -> ReLU)
    h = layernorm_relu(h, 0)
    for layer in range(1, 5):
        h = (jnp.dot(h, w_ref[pl.ds(R[layer], HP), pl.ds(0, HP)],
                     preferred_element_type=f32)
             + v_ref[pl.ds(layer, 1), pl.ds(0, HP)])
        h = layernorm_relu(h, layer)

    # reward_net: ReLU -> Linear -> ReLU  (its output Linear is fused below)
    r = jnp.maximum(r, 0.0)
    r = jnp.maximum(
        jnp.dot(r, w_ref[pl.ds(R[1], HP), pl.ds(HP, HP)], preferred_element_type=f32)
        + v_ref[pl.ds(1, 1), pl.ds(HP, HP)],
        0.0)

    # Fused lane-dense output: next_state delta -> lanes [0,S), reward -> lane S.
    net = (jnp.dot(h, w_ref[pl.ds(R[5], HP), pl.ds(0, OW)], preferred_element_type=f32)
           + jnp.dot(r, w_ref[pl.ds(R[6], HP), pl.ds(0, OW)], preferred_element_type=f32)
           + v_ref[pl.ds(5, 1), pl.ds(0, OW)])
    out_ref[...] = net                                       # one dense 128-lane store
    out_ref[:, pl.ds(0, S)] = net[:, :S] + state             # exact residual add


# ----------------------------------------------------------------------------
# Parameter init (mirrors _init_weights: orthogonal, gain=sqrt(2), zero bias;
# LayerNorm gamma=1, beta=0).  Linear weights are stored transposed [in, out].
# ----------------------------------------------------------------------------
def _orthogonal(key, in_dim, out_dim, gain):
    a = jax.random.normal(key, (max(out_dim, in_dim), min(out_dim, in_dim)),
                          dtype=jnp.float32)
    q, rr = jnp.linalg.qr(a)
    q = q * jnp.sign(jnp.diagonal(rr))
    w_out_in = q[:out_dim, :in_dim] if out_dim >= in_dim else q.T[:out_dim, :in_dim]
    return (gain * w_out_in).T                   # [in, out]


def init_params(key, state_dim, action_dim, hidden_dim):
    gain = float(np.sqrt(2.0))
    in_dim = state_dim + action_dim
    dyn_dims = [(in_dim, hidden_dim)] + [(hidden_dim, hidden_dim)] * 4 \
               + [(hidden_dim, state_dim)]
    rew_dims = [(in_dim, hidden_dim), (hidden_dim, hidden_dim), (hidden_dim, 1)]

    keys = jax.random.split(key, len(dyn_dims) + len(rew_dims))
    dW = [_orthogonal(keys[i], d_in, d_out, gain)
          for i, (d_in, d_out) in enumerate(dyn_dims)]
    dB = [jnp.zeros((1, d_out), jnp.float32) for (_, d_out) in dyn_dims]
    lG = [jnp.ones((1, hidden_dim), jnp.float32) for _ in range(5)]
    lB = [jnp.zeros((1, hidden_dim), jnp.float32) for _ in range(5)]
    rW = [_orthogonal(keys[len(dyn_dims) + i], d_in, d_out, gain)
          for i, (d_in, d_out) in enumerate(rew_dims)]
    rB = [jnp.zeros((1, d_out), jnp.float32) for (_, d_out) in rew_dims]
    return dict(dW=dW, dB=dB, lG=lG, lB=lB, rW=rW, rB=rB)


# ----------------------------------------------------------------------------
# One-time host-side packing of all parameters into two lane-dense slabs.
# ----------------------------------------------------------------------------
def pack_params(params, state_dim, action_dim, hidden_dim):
    S, A, H = state_dim, action_dim, hidden_dim
    HP = _round_up(H, 128)
    WW = 2 * HP
    OW = _round_up(S + 1, 128)
    AR = _round_up(S, 8)                      # action rows start here in block 0
    IR = AR + _round_up(A, 8)                 # rows of block 0
    R = (0, IR, IR + HP, IR + 2 * HP, IR + 3 * HP, IR + 4 * HP, IR + 5 * HP)
    WR = R[6] + HP
    VR = 16

    dW = [np.asarray(w, np.float32) for w in params["dW"]]
    dB = [np.asarray(b, np.float32).reshape(-1) for b in params["dB"]]
    lG = [np.asarray(g, np.float32).reshape(-1) for g in params["lG"]]
    lB = [np.asarray(b, np.float32).reshape(-1) for b in params["lB"]]
    rW = [np.asarray(w, np.float32) for w in params["rW"]]
    rB = [np.asarray(b, np.float32).reshape(-1) for b in params["rB"]]

    w = np.zeros((WR, WW), np.float32)
    # block 0: fused first layer (dyn | rew); rows split into state / action parts
    w[0:S, 0:H] = dW[0][0:S, :]
    w[AR:AR + A, 0:H] = dW[0][S:S + A, :]
    w[0:S, HP:HP + H] = rW[0][0:S, :]
    w[AR:AR + A, HP:HP + H] = rW[0][S:S + A, :]
    # blocks 1..4: dynamics hidden Linears; reward hidden Linear rides in block 1
    for l in range(1, 5):
        w[R[l]:R[l] + H, 0:H] = dW[l]
    w[R[1]:R[1] + H, HP:HP + H] = rW[1]
    # block 5: dynamics output Linear (H->S); block 6: reward output Linear (H->1)
    w[R[5]:R[5] + H, 0:S] = dW[5]
    w[R[6]:R[6] + H, S:S + 1] = rW[2]

    v = np.zeros((VR, WW), np.float32)
    v[0, 0:H] = dB[0]
    v[0, HP:HP + H] = rB[0]
    for l in range(1, 5):
        v[l, 0:H] = dB[l]
    v[1, HP:HP + H] = rB[1]
    v[5, 0:S] = dB[5]
    v[5, S] = rB[2][0]
    for l in range(5):
        v[6 + l, 0:H] = lG[l]
        v[11 + l, 0:H] = lB[l]

    layout = Layout(S=S, A=A, H=H, HP=HP, OW=OW, AR=AR, R=R, WR=WR, VR=VR)
    return jnp.asarray(w), jnp.asarray(v), layout


# ----------------------------------------------------------------------------
# Wrapper: batch grid + VMEM-resident parameter slabs.
# ----------------------------------------------------------------------------
@functools.partial(jax.jit, static_argnames=("layout",))
def dynamics_model_forward(state, action, w_slab, v_slab, *, layout):
    L = layout
    B = state.shape[0]
    TB = min(128, _round_up(B, 8))            # batch tile
    BP = _round_up(B, TB)

    st = state.astype(jnp.float32)
    ac = action.astype(jnp.float32)
    if BP != B:
        st = jnp.pad(st, ((0, BP - B), (0, 0)))
        ac = jnp.pad(ac, ((0, BP - B), (0, 0)))

    kernel = functools.partial(_dynamics_kernel, L=L)
    out = pl.pallas_call(
        kernel,
        out_shape=jax.ShapeDtypeStruct((BP, L.OW), jnp.float32),
        grid=(BP // TB,),
        in_specs=[
            pl.BlockSpec((TB, L.S), lambda i: (i, 0)),
            pl.BlockSpec((TB, L.A), lambda i: (i, 0)),
            pl.BlockSpec((L.WR, 2 * L.HP), lambda i: (0, 0)),   # weights: VMEM-resident
            pl.BlockSpec((L.VR, 2 * L.HP), lambda i: (0, 0)),   # bias/LN: VMEM-resident
        ],
        out_specs=pl.BlockSpec((TB, L.OW), lambda i: (i, 0)),
        compiler_params=pltpu.CompilerParams(
            dimension_semantics=("parallel",),
            vmem_limit_bytes=32 * 1024 * 1024,
        ),
    )(st, ac, w_slab, v_slab)

    next_state = out[:B, 0:L.S]
    reward = out[:B, L.S:L.S + 1]
    return next_state, reward


# ----------------------------------------------------------------------------
# Pure-JAX reference (faithful to the PyTorch module) for correctness checking.
# ----------------------------------------------------------------------------
def reference_forward(state, action, params):
    x = jnp.concatenate([state, action], axis=-1).astype(jnp.float32)
    h = x
    for i in range(5):
        h = h @ params["dW"][i] + params["dB"][i]
        mu = jnp.mean(h, axis=-1, keepdims=True)
        var = jnp.mean((h - mu) ** 2, axis=-1, keepdims=True)
        h = (h - mu) / jnp.sqrt(var + LN_EPS)
        h = h * params["lG"][i] + params["lB"][i]
        h = jnp.maximum(h, 0.0)
    delta = h @ params["dW"][5] + params["dB"][5]
    next_state = state + delta
    r = jnp.maximum(x @ params["rW"][0] + params["rB"][0], 0.0)
    r = jnp.maximum(r @ params["rW"][1] + params["rB"][1], 0.0)
    r = r @ params["rW"][2] + params["rB"][2]
    return next_state, r


if __name__ == "__main__":
    state_dim, action_dim, hidden_dim, batch = 8, 4, 32, 8

    key = jax.random.PRNGKey(0)
    k_params, k_state, k_action = jax.random.split(key, 3)
    params = init_params(k_params, state_dim, action_dim, hidden_dim)
    w_slab, v_slab, layout = pack_params(params, state_dim, action_dim, hidden_dim)

    state = jax.random.normal(k_state, (batch, state_dim), dtype=jnp.float32)
    action = jax.random.normal(k_action, (batch, action_dim), dtype=jnp.float32)

    next_state, reward = dynamics_model_forward(state, action, w_slab, v_slab,
                                                layout=layout)
    jax.block_until_ready((next_state, reward))

    ref_ns, ref_r = reference_forward(state, action, params)
    assert next_state.shape == (batch, state_dim)
    assert reward.shape == (batch, 1)
    # Tolerance sized for TPU default matmul precision (bf16-pass MXU) differences
    # between the Mosaic kernel and the XLA reference.
    assert jnp.allclose(next_state, ref_ns, atol=2e-3, rtol=2e-3), \
        float(jnp.max(jnp.abs(next_state - ref_ns)))
    assert jnp.allclose(reward, ref_r, atol=2e-3, rtol=2e-3), \
        float(jnp.max(jnp.abs(reward - ref_r)))

    print("KERNEL_OK")
</pallas_src>

<mosaic_0001>
module attributes {stable_mosaic.version = 11 : i64} {
  func.func @_dynamics_kernel(%arg0: i32, %arg1: memref<8x8xf32, #tpu.memory_space<vmem>>, %arg2: memref<8x4xf32, #tpu.memory_space<vmem>>, %arg3: memref<784x256xf32, #tpu.memory_space<vmem>>, %arg4: memref<16x256xf32, #tpu.memory_space<vmem>>, %arg5: memref<8x128xf32, #tpu.memory_space<vmem>>) attributes {dimension_semantics = [#tpu.dimension_semantics<parallel>], iteration_bounds = array<i64: 1>, scalar_prefetch = 0 : i64, scratch_operands = 0 : i64, tpu.core_type = #tpu.core_type<tc>, window_params = [{transform_indices = @transform_0, window_bounds = array<i64: 8, 8>}, {transform_indices = @transform_1, window_bounds = array<i64: 8, 4>}, {pipeline_mode = #tpu.pipeline_mode<synchronous>, transform_indices = @transform_2, window_bounds = array<i64: 784, 256>}, {pipeline_mode = #tpu.pipeline_mode<synchronous>, transform_indices = @transform_3, window_bounds = array<i64: 16, 256>}, {transform_indices = @transform_4, window_bounds = array<i64: 8, 128>}]} {
    %c0 = arith.constant 0 : index
    %c0_0 = arith.constant 0 : index
    %0 = vector.load %arg1[%c0, %c0_0] : memref<8x8xf32, #tpu.memory_space<vmem>>, vector<8x8xf32>
    %c0_1 = arith.constant 0 : index
    %c0_2 = arith.constant 0 : index
    %1 = vector.load %arg2[%c0_1, %c0_2] : memref<8x4xf32, #tpu.memory_space<vmem>>, vector<8x4xf32>
    %c0_3 = arith.constant 0 : index
    %c0_4 = arith.constant 0 : index
    %2 = vector.load %arg3[%c0_3, %c0_4] : memref<784x256xf32, #tpu.memory_space<vmem>>, vector<8x256xf32>
    %cst = arith.constant dense<0.000000e+00> : vector<8x256xf32>
    %3 = tpu.matmul %0, %2, %cst {dimension_numbers = #tpu.dot_dimension_numbers<[1], [0], [0], [1], [0, 0, 1, 1], [], []>} : vector<8x8xf32>, vector<8x256xf32>, vector<8x256xf32> -> vector<8x256xf32>
    %c8 = arith.constant 8 : index
    %c0_5 = arith.constant 0 : index
    %4 = vector.load %arg3[%c8, %c0_5] : memref<784x256xf32, #tpu.memory_space<vmem>>, vector<4x256xf32>
    %cst_6 = arith.constant dense<0.000000e+00> : vector<8x256xf32>
    %5 = tpu.matmul %1, %4, %cst_6 {dimension_numbers = #tpu.dot_dimension_numbers<[1], [0], [0], [1], [0, 0, 1, 1], [], []>} : vector<8x4xf32>, vector<4x256xf32>, vector<8x256xf32> -> vector<8x256xf32>
    %6 = arith.addf %3, %5 : vector<8x256xf32>
    %c0_7 = arith.constant 0 : index
    %c0_8 = arith.constant 0 : index
    %7 = vector.load %arg4[%c0_7, %c0_8] : memref<16x256xf32, #tpu.memory_space<vmem>>, vector<1x256xf32>
    %8 = vector.broadcast %7 : vector<1x256xf32> to vector<8x256xf32>
    %9 = arith.addf %6, %8 : vector<8x256xf32>
    %10 = vector.extract_strided_slice %9 {offsets = [0, 0], sizes = [8, 128], strides = [1, 1]} : vector<8x256xf32> to vector<8x128xf32>
    %11 = vector.extract_strided_slice %9 {offsets = [0, 128], sizes = [8, 128], strides = [1, 1]} : vector<8x256xf32> to vector<8x128xf32>
    %cst_9 = arith.constant dense<0.000000e+00> : vector<8xf32>
    %12 = vector.multi_reduction <add>, %10, %cst_9 [1] : vector<8x128xf32> to vector<8xf32>
    %13 = vector.shape_cast %12 : vector<8xf32> to vector<8x1xf32>
    %14 = arith.mulf %10, %10 : vector<8x128xf32>
    %cst_10 = arith.constant dense<0.000000e+00> : vector<8xf32>
    %15 = vector.multi_reduction <add>, %14, %cst_10 [1] : vector<8x128xf32> to vector<8xf32>
    %16 = vector.shape_cast %15 : vector<8xf32> to vector<8x1xf32>
    %cst_11 = arith.constant 3.125000e-02 : f32
    %17 = vector.broadcast %cst_11 : f32 to vector<8x1xf32>
    %18 = arith.mulf %13, %17 : vector<8x1xf32>
    %cst_12 = arith.constant 3.125000e-02 : f32
    %19 = vector.broadcast %cst_12 : f32 to vector<8x1xf32>
    %20 = arith.mulf %16, %19 : vector<8x1xf32>
    %21 = arith.mulf %18, %18 : vector<8x1xf32>
    %22 = arith.subf %20, %21 : vector<8x1xf32>
    %23 = vector.broadcast %18 : vector<8x1xf32> to vector<8x128xf32>
    %24 = arith.subf %10, %23 : vector<8x128xf32>
    %cst_13 = arith.constant 9.99999974E-6 : f32
    %25 = vector.broadcast %cst_13 : f32 to vector<8x1xf32>
    %26 = arith.addf %22, %25 : vector<8x1xf32>
    %27 = math.rsqrt %26 : vector<8x1xf32>
    %28 = vector.broadcast %27 : vector<8x1xf32> to vector<8x128xf32>
    %29 = arith.mulf %24, %28 : vector<8x128xf32>
    %c6 = arith.constant 6 : index
    %c0_14 = arith.constant 0 : index
    %30 = vector.load %arg4[%c6, %c0_14] : memref<16x256xf32, #tpu.memory_space<vmem>>, vector<1x128xf32>
    %c11 = arith.constant 11 : index
    %c0_15 = arith.constant 0 : index
    %31 = vector.load %arg4[%c11, %c0_15] : memref<16x256xf32, #tpu.memory_space<vmem>>, vector<1x128xf32>
    %32 = vector.broadcast %30 : vector<1x128xf32> to vector<8x128xf32>
    %33 = arith.mulf %29, %32 : vector<8x128xf32>
    %34 = vector.broadcast %31 : vector<1x128xf32> to vector<8x128xf32>
    %35 = arith.addf %33, %34 : vector<8x128xf32>
    %cst_16 = arith.constant 0.000000e+00 : f32
    %36 = vector.broadcast %cst_16 : f32 to vector<8x128xf32>
    %37 = arith.maximumf %35, %36 : vector<8x128xf32>
    %c16 = arith.constant 16 : index
    %c0_17 = arith.constant 0 : index
    %38 = vector.load %arg3[%c16, %c0_17] : memref<784x256xf32, #tpu.memory_space<vmem>>, vector<128x128xf32>
    %cst_18 = arith.constant dense<0.000000e+00> : vector<8x128xf32>
    %39 = tpu.matmul %37, %38, %cst_18 {dimension_numbers = #tpu.dot_dimension_numbers<[1], [0], [0], [1], [0, 0, 1, 1], [], []>} : vector<8x128xf32>, vector<128x128xf32>, vector<8x128xf32> -> vector<8x128xf32>
    %c1 = arith.constant 1 : index
    %c0_19 = arith.constant 0 : index
    %40 = vector.load %arg4[%c1, %c0_19] : memref<16x256xf32, #tpu.memory_space<vmem>>, vector<1x128xf32>
    %41 = vector.broadcast %40 : vector<1x128xf32> to vector<8x128xf32>
    %42 = arith.addf %39, %41 : vector<8x128xf32>
    %cst_20 = arith.constant dense<0.000000e+00> : vector<8xf32>
    %43 = vector.multi_reduction <add>, %42, %cst_20 [1] : vector<8x128xf32> to vector<8xf32>
    %44 = vector.shape_cast %43 : vector<8xf32> to vector<8x1xf32>
    %45 = arith.mulf %42, %42 : vector<8x128xf32>
    %cst_21 = arith.constant dense<0.000000e+00> : vector<8xf32>
    %46 = vector.multi_reduction <add>, %45, %cst_21 [1] : vector<8x128xf32> to vector<8xf32>
    %47 = vector.shape_cast %46 : vector<8xf32> to vector<8x1xf32>
    %cst_22 = arith.constant 3.125000e-02 : f32
    %48 = vector.broadcast %cst_22 : f32 to vector<8x1xf32>
    %49 = arith.mulf %44, %48 : vector<8x1xf32>
    %cst_23 = arith.constant 3.125000e-02 : f32
    %50 = vector.broadcast %cst_23 : f32 to vector<8x1xf32>
    %51 = arith.mulf %47, %50 : vector<8x1xf32>
    %52 = arith.mulf %49, %49 : vector<8x1xf32>
    %53 = arith.subf %51, %52 : vector<8x1xf32>
    %54 = vector.broadcast %49 : vector<8x1xf32> to vector<8x128xf32>
    %55 = arith.subf %42, %54 : vector<8x128xf32>
    %cst_24 = arith.constant 9.99999974E-6 : f32
    %56 = vector.broadcast %cst_24 : f32 to vector<8x1xf32>
    %57 = arith.addf %53, %56 : vector<8x1xf32>
    %58 = math.rsqrt %57 : vector<8x1xf32>
    %59 = vector.broadcast %58 : vector<8x1xf32> to vector<8x128xf32>
    %60 = arith.mulf %55, %59 : vector<8x128xf32>
    %c7 = arith.constant 7 : index
    %c0_25 = arith.constant 0 : index
    %61 = vector.load %arg4[%c7, %c0_25] : memref<16x256xf32, #tpu.memory_space<vmem>>, vector<1x128xf32>
    %c12 = arith.constant 12 : index
    %c0_26 = arith.constant 0 : index
    %62 = vector.load %arg4[%c12, %c0_26] : memref<16x256xf32, #tpu.memory_space<vmem>>, vector<1x128xf32>
    %63 = vector.broadcast %61 : vector<1x128xf32> to vector<8x128xf32>
    %64 = arith.mulf %60, %63 : vector<8x128xf32>
    %65 = vector.broadcast %62 : vector<1x128xf32> to vector<8x128xf32>
    %66 = arith.addf %64, %65 : vector<8x128xf32>
    %cst_27 = arith.constant 0.000000e+00 : f32
    %67 = vector.broadcast %cst_27 : f32 to vector<8x128xf32>
    %68 = arith.maximumf %66, %67 : vector<8x128xf32>
    %c144 = arith.constant 144 : index
    %c0_28 = arith.constant 0 : index
    %69 = vector.load %arg3[%c144, %c0_28] : memref<784x256xf32, #tpu.memory_space<vmem>>, vector<128x128xf32>
    %cst_29 = arith.constant dense<0.000000e+00> : vector<8x128xf32>
    %70 = tpu.matmul %68, %69, %cst_29 {dimension_numbers = #tpu.dot_dimension_numbers<[1], [0], [0], [1], [0, 0, 1, 1], [], []>} : vector<8x128xf32>, vector<128x128xf32>, vector<8x128xf32> -> vector<8x128xf32>
    %c2 = arith.constant 2 : index
    %c0_30 = arith.constant 0 : index
    %71 = vector.load %arg4[%c2, %c0_30] : memref<16x256xf32, #tpu.memory_space<vmem>>, vector<1x128xf32>
    %72 = vector.broadcast %71 : vector<1x128xf32> to vector<8x128xf32>
    %73 = arith.addf %70, %72 : vector<8x128xf32>
    %cst_31 = arith.constant dense<0.000000e+00> : vector<8xf32>
    %74 = vector.multi_reduction <add>, %73, %cst_31 [1] : vector<8x128xf32> to vector<8xf32>
    %75 = vector.shape_cast %74 : vector<8xf32> to vector<8x1xf32>
    %76 = arith.mulf %73, %73 : vector<8x128xf32>
    %cst_32 = arith.constant dense<0.000000e+00> : vector<8xf32>
    %77 = vector.multi_reduction <add>, %76, %cst_32 [1] : vector<8x128xf32> to vector<8xf32>
    %78 = vector.shape_cast %77 : vector<8xf32> to vector<8x1xf32>
    %cst_33 = arith.constant 3.125000e-02 : f32
    %79 = vector.broadcast %cst_33 : f32 to vector<8x1xf32>
    %80 = arith.mulf %75, %79 : vector<8x1xf32>
    %cst_34 = arith.constant 3.125000e-02 : f32
    %81 = vector.broadcast %cst_34 : f32 to vector<8x1xf32>
    %82 = arith.mulf %78, %81 : vector<8x1xf32>
    %83 = arith.mulf %80, %80 : vector<8x1xf32>
    %84 = arith.subf %82, %83 : vector<8x1xf32>
    %85 = vector.broadcast %80 : vector<8x1xf32> to vector<8x128xf32>
    %86 = arith.subf %73, %85 : vector<8x128xf32>
    %cst_35 = arith.constant 9.99999974E-6 : f32
    %87 = vector.broadcast %cst_35 : f32 to vector<8x1xf32>
    %88 = arith.addf %84, %87 : vector<8x1xf32>
    %89 = math.rsqrt %88 : vector<8x1xf32>
    %90 = vector.broadcast %89 : vector<8x1xf32> to vector<8x128xf32>
    %91 = arith.mulf %86, %90 : vector<8x128xf32>
    %c8_36 = arith.constant 8 : index
    %c0_37 = arith.constant 0 : index
    %92 = vector.load %arg4[%c8_36, %c0_37] : memref<16x256xf32, #tpu.memory_space<vmem>>, vector<1x128xf32>
    %c13 = arith.constant 13 : index
    %c0_38 = arith.constant 0 : index
    %93 = vector.load %arg4[%c13, %c0_38] : memref<16x256xf32, #tpu.memory_space<vmem>>, vector<1x128xf32>
    %94 = vector.broadcast %92 : vector<1x128xf32> to vector<8x128xf32>
    %95 = arith.mulf %91, %94 : vector<8x128xf32>
    %96 = vector.broadcast %93 : vector<1x128xf32> to vector<8x128xf32>
    %97 = arith.addf %95, %96 : vector<8x128xf32>
    %cst_39 = arith.constant 0.000000e+00 : f32
    %98 = vector.broadcast %cst_39 : f32 to vector<8x128xf32>
    %99 = arith.maximumf %97, %98 : vector<8x128xf32>
    %c272 = arith.constant 272 : index
    %c0_40 = arith.constant 0 : index
    %100 = vector.load %arg3[%c272, %c0_40] : memref<784x256xf32, #tpu.memory_space<vmem>>, vector<128x128xf32>
    %cst_41 = arith.constant dense<0.000000e+00> : vector<8x128xf32>
    %101 = tpu.matmul %99, %100, %cst_41 {dimension_numbers = #tpu.dot_dimension_numbers<[1], [0], [0], [1], [0, 0, 1, 1], [], []>} : vector<8x128xf32>, vector<128x128xf32>, vector<8x128xf32> -> vector<8x128xf32>
    %c3 = arith.constant 3 : index
    %c0_42 = arith.constant 0 : index
    %102 = vector.load %arg4[%c3, %c0_42] : memref<16x256xf32, #tpu.memory_space<vmem>>, vector<1x128xf32>
    %103 = vector.broadcast %102 : vector<1x128xf32> to vector<8x128xf32>
    %104 = arith.addf %101, %103 : vector<8x128xf32>
    %cst_43 = arith.constant dense<0.000000e+00> : vector<8xf32>
    %105 = vector.multi_reduction <add>, %104, %cst_43 [1] : vector<8x128xf32> to vector<8xf32>
    %106 = vector.shape_cast %105 : vector<8xf32> to vector<8x1xf32>
    %107 = arith.mulf %104, %104 : vector<8x128xf32>
    %cst_44 = arith.constant dense<0.000000e+00> : vector<8xf32>
    %108 = vector.multi_reduction <add>, %107, %cst_44 [1] : vector<8x128xf32> to vector<8xf32>
    %109 = vector.shape_cast %108 : vector<8xf32> to vector<8x1xf32>
    %cst_45 = arith.constant 3.125000e-02 : f32
    %110 = vector.broadcast %cst_45 : f32 to vector<8x1xf32>
    %111 = arith.mulf %106, %110 : vector<8x1xf32>
    %cst_46 = arith.constant 3.125000e-02 : f32
    %112 = vector.broadcast %cst_46 : f32 to vector<8x1xf32>
    %113 = arith.mulf %109, %112 : vector<8x1xf32>
    %114 = arith.mulf %111, %111 : vector<8x1xf32>
    %115 = arith.subf %113, %114 : vector<8x1xf32>
    %116 = vector.broadcast %111 : vector<8x1xf32> to vector<8x128xf32>
    %117 = arith.subf %104, %116 : vector<8x128xf32>
    %cst_47 = arith.constant 9.99999974E-6 : f32
    %118 = vector.broadcast %cst_47 : f32 to vector<8x1xf32>
    %119 = arith.addf %115, %118 : vector<8x1xf32>
    %120 = math.rsqrt %119 : vector<8x1xf32>
    %121 = vector.broadcast %120 : vector<8x1xf32> to vector<8x128xf32>
    %122 = arith.mulf %117, %121 : vector<8x128xf32>
    %c9 = arith.constant 9 : index
    %c0_48 = arith.constant 0 : index
    %123 = vector.load %arg4[%c9, %c0_48] : memref<16x256xf32, #tpu.memory_space<vmem>>, vector<1x128xf32>
    %c14 = arith.constant 14 : index
    %c0_49 = arith.constant 0 : index
    %124 = vector.load %arg4[%c14, %c0_49] : memref<16x256xf32, #tpu.memory_space<vmem>>, vector<1x128xf32>
    %125 = vector.broadcast %123 : vector<1x128xf32> to vector<8x128xf32>
    %126 = arith.mulf %122, %125 : vector<8x128xf32>
    %127 = vector.broadcast %124 : vector<1x128xf32> to vector<8x128xf32>
    %128 = arith.addf %126, %127 : vector<8x128xf32>
    %cst_50 = arith.constant 0.000000e+00 : f32
    %129 = vector.broadcast %cst_50 : f32 to vector<8x128xf32>
    %130 = arith.maximumf %128, %129 : vector<8x128xf32>
    %c400 = arith.constant 400 : index
    %c0_51 = arith.constant 0 : index
    %131 = vector.load %arg3[%c400, %c0_51] : memref<784x256xf32, #tpu.memory_space<vmem>>, vector<128x128xf32>
    %cst_52 = arith.constant dense<0.000000e+00> : vector<8x128xf32>
    %132 = tpu.matmul %130, %131, %cst_52 {dimension_numbers = #tpu.dot_dimension_numbers<[1], [0], [0], [1], [0, 0, 1, 1], [], []>} : vector<8x128xf32>, vector<128x128xf32>, vector<8x128xf32> -> vector<8x128xf32>
    %c4 = arith.constant 4 : index
    %c0_53 = arith.constant 0 : index
    %133 = vector.load %arg4[%c4, %c0_53] : memref<16x256xf32, #tpu.memory_space<vmem>>, vector<1x128xf32>
    %134 = vector.broadcast %133 : vector<1x128xf32> to vector<8x128xf32>
    %135 = arith.addf %132, %134 : vector<8x128xf32>
    %cst_54 = arith.constant dense<0.000000e+00> : vector<8xf32>
    %136 = vector.multi_reduction <add>, %135, %cst_54 [1] : vector<8x128xf32> to vector<8xf32>
    %137 = vector.shape_cast %136 : vector<8xf32> to vector<8x1xf32>
    %138 = arith.mulf %135, %135 : vector<8x128xf32>
    %cst_55 = arith.constant dense<0.000000e+00> : vector<8xf32>
    %139 = vector.multi_reduction <add>, %138, %cst_55 [1] : vector<8x128xf32> to vector<8xf32>
    %140 = vector.shape_cast %139 : vector<8xf32> to vector<8x1xf32>
    %cst_56 = arith.constant 3.125000e-02 : f32
    %141 = vector.broadcast %cst_56 : f32 to vector<8x1xf32>
    %142 = arith.mulf %137, %141 : vector<8x1xf32>
    %cst_57 = arith.constant 3.125000e-02 : f32
    %143 = vector.broadcast %cst_57 : f32 to vector<8x1xf32>
    %144 = arith.mulf %140, %143 : vector<8x1xf32>
    %145 = arith.mulf %142, %142 : vector<8x1xf32>
    %146 = arith.subf %144, %145 : vector<8x1xf32>
    %147 = vector.broadcast %142 : vector<8x1xf32> to vector<8x128xf32>
    %148 = arith.subf %135, %147 : vector<8x128xf32>
    %cst_58 = arith.constant 9.99999974E-6 : f32
    %149 = vector.broadcast %cst_58 : f32 to vector<8x1xf32>
    %150 = arith.addf %146, %149 : vector<8x1xf32>
    %151 = math.rsqrt %150 : vector<8x1xf32>
    %152 = vector.broadcast %151 : vector<8x1xf32> to vector<8x128xf32>
    %153 = arith.mulf %148, %152 : vector<8x128xf32>
    %c10 = arith.constant 10 : index
    %c0_59 = arith.constant 0 : index
    %154 = vector.load %arg4[%c10, %c0_59] : memref<16x256xf32, #tpu.memory_space<vmem>>, vector<1x128xf32>
    %c15 = arith.constant 15 : index
    %c0_60 = arith.constant 0 : index
    %155 = vector.load %arg4[%c15, %c0_60] : memref<16x256xf32, #tpu.memory_space<vmem>>, vector<1x128xf32>
    %156 = vector.broadcast %154 : vector<1x128xf32> to vector<8x128xf32>
    %157 = arith.mulf %153, %156 : vector<8x128xf32>
    %158 = vector.broadcast %155 : vector<1x128xf32> to vector<8x128xf32>
    %159 = arith.addf %157, %158 : vector<8x128xf32>
    %cst_61 = arith.constant 0.000000e+00 : f32
    %160 = vector.broadcast %cst_61 : f32 to vector<8x128xf32>
    %161 = arith.maximumf %159, %160 : vector<8x128xf32>
    %cst_62 = arith.constant 0.000000e+00 : f32
    %162 = vector.broadcast %cst_62 : f32 to vector<8x128xf32>
    %163 = arith.maximumf %11, %162 : vector<8x128xf32>
    %c16_63 = arith.constant 16 : index
    %c128 = arith.constant 128 : index
    %164 = vector.load %arg3[%c16_63, %c128] : memref<784x256xf32, #tpu.memory_space<vmem>>, vector<128x128xf32>
    %cst_64 = arith.constant dense<0.000000e+00> : vector<8x128xf32>
    %165 = tpu.matmul %163, %164, %cst_64 {dimension_numbers = #tpu.dot_dimension_numbers<[1], [0], [0], [1], [0, 0, 1, 1], [], []>} : vector<8x128xf32>, vector<128x128xf32>, vector<8x128xf32> -> vector<8x128xf32>
    %c1_65 = arith.constant 1 : index
    %c128_66 = arith.constant 128 : index
    %166 = vector.load %arg4[%c1_65, %c128_66] : memref<16x256xf32, #tpu.memory_space<vmem>>, vector<1x128xf32>
    %167 = vector.broadcast %166 : vector<1x128xf32> to vector<8x128xf32>
    %168 = arith.addf %165, %167 : vector<8x128xf32>
    %cst_67 = arith.constant 0.000000e+00 : f32
    %169 = vector.broadcast %cst_67 : f32 to vector<8x128xf32>
    %170 = arith.maximumf %168, %169 : vector<8x128xf32>
    %c528 = arith.constant 528 : index
    %c0_68 = arith.constant 0 : index
    %171 = vector.load %arg3[%c528, %c0_68] : memref<784x256xf32, #tpu.memory_space<vmem>>, vector<128x128xf32>
    %cst_69 = arith.constant dense<0.000000e+00> : vector<8x128xf32>
    %172 = tpu.matmul %161, %171, %cst_69 {dimension_numbers = #tpu.dot_dimension_numbers<[1], [0], [0], [1], [0, 0, 1, 1], [], []>} : vector<8x128xf32>, vector<128x128xf32>, vector<8x128xf32> -> vector<8x128xf32>
    %c656 = arith.constant 656 : index
    %c0_70 = arith.constant 0 : index
    %173 = vector.load %arg3[%c656, %c0_70] : memref<784x256xf32, #tpu.memory_space<vmem>>, vector<128x128xf32>
    %cst_71 = arith.constant dense<0.000000e+00> : vector<8x128xf32>
    %174 = tpu.matmul %170, %173, %cst_71 {dimension_numbers = #tpu.dot_dimension_numbers<[1], [0], [0], [1], [0, 0, 1, 1], [], []>} : vector<8x128xf32>, vector<128x128xf32>, vector<8x128xf32> -> vector<8x128xf32>
    %175 = arith.addf %172, %174 : vector<8x128xf32>
    %c5 = arith.constant 5 : index
    %c0_72 = arith.constant 0 : index
    %176 = vector.load %arg4[%c5, %c0_72] : memref<16x256xf32, #tpu.memory_space<vmem>>, vector<1x128xf32>
    %177 = vector.broadcast %176 : vector<1x128xf32> to vector<8x128xf32>
    %178 = arith.addf %175, %177 : vector<8x128xf32>
    %c0_73 = arith.constant 0 : index
    %c0_74 = arith.constant 0 : index
    %179 = vector.load %arg5[%c0_73, %c0_74] : memref<8x128xf32, #tpu.memory_space<vmem>>, vector<8x128xf32>
    tpu.vector_store %arg5[%c0_73, %c0_74], %178 {strides = array<i32>} : memref<8x128xf32, #tpu.memory_space<vmem>>, vector<8x128xf32>,
    %180 = vector.extract_strided_slice %178 {offsets = [0, 0], sizes = [8, 8], strides = [1, 1]} : vector<8x128xf32> to vector<8x8xf32>
    %181 = arith.addf %180, %0 : vector<8x8xf32>
    %c0_75 = arith.constant 0 : index
    %c0_76 = arith.constant 0 : index
    %182 = vector.load %arg5[%c0_75, %c0_76] : memref<8x128xf32, #tpu.memory_space<vmem>>, vector<8x8xf32>
    tpu.vector_store %arg5[%c0_75, %c0_76], %181 {strides = array<i32>} : memref<8x128xf32, #tpu.memory_space<vmem>>, vector<8x8xf32>,
    return
  }
  func.func @transform_0(%arg0: i32) -> (i32, i32) {
    %c0_i32 = arith.constant 0 : i32
    %c0_i32_0 = arith.constant 0 : i32
    return %arg0, %c0_i32 : i32, i32
  }
  func.func @transform_1(%arg0: i32) -> (i32, i32) {
    %c0_i32 = arith.constant 0 : i32
    %c0_i32_0 = arith.constant 0 : i32
    return %arg0, %c0_i32 : i32, i32
  }
  func.func @transform_2(%arg0: i32) -> (i32, i32) {
    %c0_i32 = arith.constant 0 : i32
    %c0_i32_0 = arith.constant 0 : i32
    %c0_i32_1 = arith.constant 0 : i32
    return %c0_i32, %c0_i32_0 : i32, i32
  }
  func.func @transform_3(%arg0: i32) -> (i32, i32) {
    %c0_i32 = arith.constant 0 : i32
    %c0_i32_0 = arith.constant 0 : i32
    %c0_i32_1 = arith.constant 0 : i32
    return %c0_i32, %c0_i32_0 : i32, i32
  }
  func.func @transform_4(%arg0: i32) -> (i32, i32) {
    %c0_i32 = arith.constant 0 : i32
    %c0_i32_0 = arith.constant 0 : i32
    return %arg0, %c0_i32 : i32, i32
  }
}

</mosaic_0001>

<bundles_post_ra>
// kernel: dynamics_model_forward.1
= control target key start
LH: loop header
LB: loop body
LE: loop exit
PB: predicated region body
PF: predicated region fallthrough
CT: control target
= control target key end

     0   :  { %9 = vsyncpa [#allocation3], 0  ;;  %s1573_s0 = inlined_call_operand.vmem [shape: f32[8,8], index: 0, kind: input, shape index: {}]   ;;  %s1574_s1 = inlined_call_operand.vmem [shape: f32[8,4], index: 1, kind: input, shape index: {}]   ;;  %s1575_s2 = inlined_call_operand.hbm [shape: f32[784,256], index: 2, kind: input, shape index: {}]   ;;  %s1576_s3 = inlined_call_operand.hbm [shape: f32[16,256], index: 3, kind: input, shape index: {}]   ;;  %s1577_s4 = inlined_call_operand.vmem [shape: f32[8,128], index: 4, kind: output, shape index: {}]  }
   0x1   :  { %10 = vsyncpa [#allocation5], 0  ;;  %s1360_s15 = smov [#allocation2]  }
   0x2   :  { %s20_s16 = sshll.u32 %s1360_s15, 4  ;;  %s21_s16 = int_to_ptr.vmem [resolvable:$true] %s20_s16 }
   0x3   :  { %s1324_s17 = scalar_lea.vmem %s21_s16, 25088  ;;  %p1329_p1 = scmp.lt.s32.totalorder %s21_s16, %s21_s16 }
   0x4   :  { %p1325_p0 = scmp.ne.s32.totalorder %s21_s16, %s1324_s17  ;;  %p1330_p2 = scmp.lt.s32.totalorder %s1324_s17, %s1324_s17 }
   0x6   :  { %p1331_p3 = por %p1330_p2, %p1329_p1 }
   0x8   :  { %p1332_p4 = pnand %p1331_p3, %p1325_p0 }
   0xa   :  { %1335 = shalt.err (!%p1332_p4)
}
   0xb   :  { %s1361_s18 = smov 256   ;;  %s1362_s19 = smov 16  }
   0xc   :  { %26 = dma.hbm_to_vmem [thread:$0]  %s1575_s2, 25088, %s21_s16, [#allocation3], %s1361_s18, %s1361_s18, %s1362_s19  }
   0xd   :  { %s1363_s22 = smov [#allocation4]  }
   0xe   :  { %s32_s23 = sshll.u32 %s1363_s22, 4  ;;  %s33_s23 = int_to_ptr.vmem [resolvable:$true] %s32_s23 }
   0xf   :  { %s1344_s24 = scalar_lea.vmem %s33_s23, 512  ;;  %p1349_p6 = scmp.lt.s32.totalorder %s33_s23, %s33_s23 }
  0x10   :  { %p1345_p5 = scmp.ne.s32.totalorder %s33_s23, %s1344_s24  ;;  %p1350_p7 = scmp.lt.s32.totalorder %s1344_s24, %s1344_s24 }
  0x12   :  { %p1351_p8 = por %p1350_p7, %p1349_p6 }
  0x14   :  { %p1352_p9 = pnand %p1351_p8, %p1345_p5 }
  0x16   :  { %1355 = shalt.err (!%p1352_p9)
}
  0x17   :  { %38 = dma.hbm_to_vmem [thread:$0]  %s1576_s3, 512, %s33_s23, [#allocation5], %s1361_s18, %s1361_s18, %s1362_s19  }
  0x18   :  { %1356 = dma.done.wait [#allocation3], 25088  }
  0x19   :  { %1357 = vsyncadd [#allocation3], 4294942208 }
  0x1a   :  { %1358 = dma.done.wait [#allocation5], 512  }
  0x1b   :  { %1359 = vsyncadd [#allocation5], 4294966784  ;;  %v1364_v0 = vmov 0.0   ;;  %vm55_vm0 = vcmask 1043456   ;;  %v50_v1 = vld [vmem:[#allocation2 + $0x18] sm:$0xf]  ;;  %v210_v7 = vlaneseq }
  0x1c   :  { %126 = vmatprep.mubr.f32.mxu1 %v1364_v0  ;;  %1055 = vmatprep.subr.mxu0 %v1364_v0  ;;  %v49_v2 = vld [vmem:[#allocation2 + $0x10] sm:$0xf]  ;;  %v46_v3 = vld [vmem:[%s1574_s1] sm:$0xff]  ;;  %vm51_vm1 = vcmask 31744   ;;  %v48_v4 = vld [vmem:[#allocation2 + $0x8] sm:$0xff]  ;;  %vm133_vm2 = vcmask 64512  }
  0x1d   :  { %932 = vmatprep.subr.msk.mxu1 %vm55_vm0, %v50_v1  ;;  %v47_v5 = vld [vmem:[#allocation2] sm:$0xff]  ;;  %v211_v8 = vshrl.u32 %v210_v7, 7  ;;  %v255_v23 = vld [vmem:[#allocation2 + $0x110] sm:$0xff]  ;;  %vm1365_vm3 = vmmov 0  }
  0x1e   :  { %933 = vmatpush1.msk.msra.mxu1 %vm55_vm0, %v49_v2  ;;  %v1406_v6 = vld [vmem:[%s1573_s0] sm:$0xff]  ;;  %1056 = vmatpush3.msra.mxu0 %v255_v23  ;;  %v253_v25 = vld [vmem:[#allocation2 + $0xf0] sm:$0xff] }
  0x1f   :  { %934 = vmatmul.mubr.msk.f32.vlgmr.msra.gmra.mxu1 %vm51_vm1, %v46_v3  ;;  %167 = vmatprep.subr.mxu1 %v48_v4  ;;  %v216_v9 = vsub.s32 1, %v211_v8  ;;  %v208_v10 = vld [vmem:[#allocation4] ss:$8 sm:$0x3]  ;;  %v212_v12 = vsub.s32 0, %v211_v8  ;;  %v251_v27 = vld [vmem:[#allocation2 + $0xd0] sm:$0xff] }
  0x20   :  { %168 = vmatpush1.msra.mxu1 %v47_v5  ;;  %201 = vmatprep.mubr.f32.mxu1 %v1364_v0  ;;  %v254_v24 = vld [vmem:[#allocation2 + $0x100] sm:$0xff]  ;;  %v249_v29 = vld [vmem:[#allocation2 + $0xb0] sm:$0xff] }
  0x21   :  { %1090 = vmatprep.subr.mxu1 %v1364_v0  ;;  %v217_v11 = vrot.slane %v208_v10, %v216_v9  ;;  %v213_v15 = vrot.slane %v208_v10, %v212_v12  ;;  %1057 = vmatprep.subr.mxu0 %v1364_v0  ;;  %v252_v26 = vld [vmem:[#allocation2 + $0xe0] sm:$0xff]  ;;  %v247_v31 = vld [vmem:[#allocation2 + $0x90] sm:$0xff] }
  0x22   :  { %1058 = vmatpush3.msra.mxu0 %v254_v24  ;;  %v250_v28 = vld [vmem:[#allocation2 + $0xc0] sm:$0xff]  ;;  %1087 = vmatprep.mubr.msk.f32.mxu0 %vm1365_vm3, %v1364_v0  ;;  %v245_v33 = vld [vmem:[#allocation2 + $0x70] sm:$0xff] }
  0x23   :  { %935 = vmatmul.mubr.msk.f32.vlgmr.msra.gmra.mxu1 %vm133_vm2, %v1406_v6  ;;  %1059 = vmatprep.subr.mxu0 %v1364_v0  ;;  %v248_v30 = vld [vmem:[#allocation2 + $0xa0] sm:$0xff]  ;;  %v243_v35 = vld [vmem:[#allocation2 + $0x50] sm:$0xff] }
  0x24   :  { %1060 = vmatpush3.msra.mxu0 %v253_v25  ;;  %1122 = vmatprep.mubr.msk.f32.mxu1 %vm1365_vm3, %v1364_v0  ;;  %v246_v32 = vld [vmem:[#allocation2 + $0x80] sm:$0xff]  ;;  %v241_v37 = vld [vmem:[#allocation2 + $0x30] sm:$0xff] }
  0x25   :  { %1061 = vmatprep.subr.mxu0 %v1364_v0  ;;  %v244_v34 = vld [vmem:[#allocation2 + $0x60] sm:$0xff]  ;;  %v236_v50 = vld [vmem:[#allocation4 + $0x13] ss:$0 sm:$0xff]  ;;  %v341_v25 = vld [vmem:[#allocation4 + $0x14] ss:$0 sm:$0xff] }
  0x26   :  { %1062 = vmatpush3.msra.mxu0 %v252_v26  ;;  %v242_v36 = vld [vmem:[#allocation2 + $0x40] sm:$0xff]  ;;  %v360_v59 = vld [vmem:[#allocation2 + $0x210] sm:$0xff] }
  0x27   :  { %1063 = vmatprep.subr.mxu0 %v1364_v0  ;;  %v240_v38 = vld [vmem:[#allocation2 + $0x20] sm:$0xff]  ;;  %1091 = vmatpush3.msra.mxu1 %v360_v59  ;;  %v358_v61 = vld [vmem:[#allocation2 + $0x1f0] sm:$0xff] }
  0x28   :  { %1064 = vmatpush3.msra.mxu0 %v251_v27  ;;  %v235_v48 = vld [vmem:[#allocation4 + $0x6] ss:$0 sm:$0xff]  ;;  %v256_v54 = vld [vmem:[#allocation4 + $0x1] ss:$0 sm:$0xff]  ;;  %1092 = vmatprep.subr.mxu1 %v1364_v0  ;;  %v356_v63 = vld [vmem:[#allocation2 + $0x1d0] sm:$0xff] }
  0x29   :  { %1065 = vmatprep.subr.mxu0 %v1364_v0  ;;  %v359_v60 = vld [vmem:[#allocation2 + $0x200] sm:$0xff]  ;;  %v354_v2 = vld [vmem:[#allocation2 + $0x1b0] sm:$0xff] }
  0x2a   :  { %1066 = vmatpush3.msra.mxu0 %v250_v28  ;;  %1093 = vmatpush3.msra.mxu1 %v359_v60  ;;  %v357_v62 = vld [vmem:[#allocation2 + $0x1e0] sm:$0xff]  ;;  %v352_v4 = vld [vmem:[#allocation2 + $0x190] sm:$0xff] }
  0x2b   :  { %1067 = vmatprep.subr.mxu0 %v1364_v0  ;;  %1094 = vmatprep.subr.mxu1 %v1364_v0  ;;  %v355_v1 = vld [vmem:[#allocation2 + $0x1c0] sm:$0xff]  ;;  %v350_v7 = vld [vmem:[#allocation2 + $0x170] sm:$0xff] }
  0x2c   :  { %1068 = vmatpush3.msra.mxu0 %v249_v29  ;;  %1095 = vmatpush3.msra.mxu1 %v358_v61  ;;  %v353_v3 = vld [vmem:[#allocation2 + $0x1a0] sm:$0xff]  ;;  %v348_v9 = vld [vmem:[#allocation2 + $0x150] sm:$0xff] }
  0x2d   :  { %1069 = vmatprep.subr.mxu0 %v1364_v0  ;;  %1096 = vmatprep.subr.mxu1 %v1364_v0  ;;  %v351_v5 = vld [vmem:[#allocation2 + $0x180] sm:$0xff]  ;;  %v465_v29 = vld [vmem:[#allocation2 + $0x310] sm:$0xff] }
  0x2e   :  { %1070 = vmatpush3.msra.mxu0 %v248_v30  ;;  %1097 = vmatpush3.msra.mxu1 %v357_v62  ;;  %v349_v8 = vld [vmem:[#allocation2 + $0x160] sm:$0xff]  ;;  %v445_v59 = vld [vmem:[#allocation4 + $0x10] ss:$0 sm:$0xff]  ;;  %v446_v61 = vld [vmem:[#allocation4 + $0x15] ss:$0 sm:$0xff] }
  0x2f   :  { %1071 = vmatprep.subr.mxu0 %v1364_v0  ;;  %1098 = vmatprep.subr.mxu1 %v1364_v0  ;;  %v347_v10 = vld [vmem:[#allocation2 + $0x140] sm:$0xff] }
  0x30   :  { %1072 = vmatpush3.msra.mxu0 %v247_v31  ;;  %1099 = vmatpush3.msra.mxu1 %v356_v63  ;;  %v345_v12 = vld [vmem:[#allocation2 + $0x120] sm:$0xff] }
  0x31   :  { %1073 = vmatprep.subr.mxu0 %v1364_v0  ;;  %1100 = vmatprep.subr.mxu1 %v1364_v0  ;;  %v340_v23 = vld [vmem:[#allocation4 + $0x7] ss:$0 sm:$0xff]  ;;  %v361_v30 = vld [vmem:[#allocation4 + $0x2] ss:$0 sm:$0xff] }
  0x32   :  { %1074 = vmatpush3.msra.mxu0 %v246_v32  ;;  %1101 = vmatpush3.msra.mxu1 %v355_v1 }
  0x33   :  { %1075 = vmatprep.subr.mxu0 %v1364_v0  ;;  %1102 = vmatprep.subr.mxu1 %v1364_v0 }
  0x34   :  { %1076 = vmatpush3.msra.mxu0 %v245_v33  ;;  %1103 = vmatpush3.msra.mxu1 %v354_v2  ;;  %v676_v2 = vld [vmem:[#allocation2 + $0x118] sm:$0xff] }
  0x35   :  { %1077 = vmatprep.subr.mxu0 %v1364_v0  ;;  %1104 = vmatprep.subr.mxu1 %v1364_v0 }
  0x36   :  { %1078 = vmatpush3.msra.mxu0 %v244_v34  ;;  %1105 = vmatpush3.msra.mxu1 %v353_v3  ;;  %v675_v3 = vld [vmem:[#allocation2 + $0x108] sm:$0xff] }
  0x37   :  { %1079 = vmatprep.subr.mxu0 %v1364_v0  ;;  %1106 = vmatprep.subr.mxu1 %v1364_v0 }
  0x38   :  { %1080 = vmatpush3.msra.mxu0 %v243_v35  ;;  %1107 = vmatpush3.msra.mxu1 %v352_v4  ;;  %v464_v35 = vld [vmem:[#allocation2 + $0x300] sm:$0xff]  ;;  %v674_v4 = vld [vmem:[#allocation2 + $0xf8] sm:$0xff] }
  0x39   :  { %1081 = vmatprep.subr.mxu0 %v1364_v0  ;;  %1108 = vmatprep.subr.mxu1 %v1364_v0 }
  0x3a   :  { %1082 = vmatpush3.msra.mxu0 %v242_v36  ;;  %1109 = vmatpush3.msra.mxu1 %v351_v5  ;;  %v463_v36 = vld [vmem:[#allocation2 + $0x2f0] sm:$0xff]  ;;  %v673_v5 = vld [vmem:[#allocation2 + $0xe8] sm:$0xff] }
  0x3b   :  { %1083 = vmatprep.subr.mxu0 %v1364_v0  ;;  %1110 = vmatprep.subr.mxu1 %v1364_v0 }
  0x3c   :  { %1084 = vmatpush3.msra.mxu0 %v241_v37  ;;  %1111 = vmatpush3.msra.mxu1 %v350_v7  ;;  %v462_v37 = vld [vmem:[#allocation2 + $0x2e0] sm:$0xff]  ;;  %v672_v7 = vld [vmem:[#allocation2 + $0xd8] sm:$0xff] }
  0x3d   :  { %1085 = vmatprep.subr.mxu0 %v1364_v0  ;;  %1112 = vmatprep.subr.mxu1 %v1364_v0 }
  0x3e   :  { %1086 = vmatpush3.msra.mxu0 %v240_v38  ;;  %1113 = vmatpush3.msra.mxu1 %v349_v8  ;;  %v461_v38 = vld [vmem:[#allocation2 + $0x2d0] sm:$0xff]  ;;  %v671_v8 = vld [vmem:[#allocation2 + $0xc8] sm:$0xff] }
  0x3f   :  { %1125 = vmatprep.subr.mxu0 %v1364_v0  ;;  %1114 = vmatprep.subr.mxu1 %v1364_v0 }
  0x40   :  { %1115 = vmatpush3.msra.mxu1 %v348_v9  ;;  %v670_v9 = vld [vmem:[#allocation2 + $0xb8] sm:$0xff] }
  0x41   :  { %1116 = vmatprep.subr.mxu1 %v1364_v0 }
  0x42   :  { %1117 = vmatpush3.msra.mxu1 %v347_v10  ;;  %v669_v10 = vld [vmem:[#allocation2 + $0xa8] sm:$0xff] }
  0x43   :  { %1118 = vmatprep.subr.mxu1 %v1364_v0 }
  0xdf   :  { %v128_v13 = vpop.f32.mrf.mxu1 }
  0xe1   :  { %v130_v14 = vpop.f32.mrf.mxu1 }
  0xe3   :  { %v203_v16 = vpop.f32.mrf.mxu1 }
  0xe4   :  { %v204_v17 = vadd.f32 %v203_v16, %v128_v13 }
  0xe5   :  { %v205_v18 = vpop.f32.mrf.mxu1 }
  0xe6   :  { %v1411_v19 = vadd.f32 %v213_v15, %v204_v17  ;;  %v206_v20 = vadd.f32 %v205_v18, %v130_v14 }
  0xe8   :  { %v1413_v21 = vadd.f32 %v217_v11, %v206_v20  ;;  %222 = vadd.xlane.f32.xlu0 %v1411_v19  ;;  %v224_v22 = vmul.f32 %v1411_v19, %v1411_v19  ;;  %v346_v11 = vld [vmem:[#allocation2 + $0x130] sm:$0xff] }
  0xe9   :  { %1119 = vmatpush3.msra.mxu1 %v346_v11  ;;  %v668_v11 = vld [vmem:[#allocation2 + $0x98] sm:$0xff] }
  0xea   :  { %1120 = vmatprep.subr.mxu1 %v1364_v0 }
  0xeb   :  { %1121 = vmatpush3.msra.mxu1 %v345_v12  ;;  %v667_v12 = vld [vmem:[#allocation2 + $0x88] sm:$0xff] }
  0xec   :  { %225 = vadd.xlane.f32.xlu0 %v224_v22  ;;  %1160 = vmatprep.subr.mxu1 %v1364_v0 }
 0x171   :  { %v223_v39 = vpop.xlane.xlu0 %222 }
 0x172   :  { %v227_v40 = vmul.f32 0.03125, %v223_v39  ;;  %v460_v39 = vld [vmem:[#allocation2 + $0x2c0] sm:$0xff] }
 0x174   :  { %v229_v42 = vmul.f32 %v227_v40, %v227_v40  ;;  %v231_v46 = vsub.f32 %v1411_v19, %v227_v40  ;;  %v459_v40 = vld [vmem:[#allocation2 + $0x2b0] sm:$0xff] }
 0x175   :  { %v226_v41 = vpop.xlane.xlu0 %225 }
 0x176   :  { %v228_v43 = vmul.f32 0.03125, %v226_v41  ;;  %v458_v41 = vld [vmem:[#allocation2 + $0x2a0] sm:$0xff] }
 0x178   :  { %v230_v44 = vsub.f32 %v228_v43, %v229_v42  ;;  %v457_v42 = vld [vmem:[#allocation2 + $0x290] sm:$0xff]  ;;  %v456_v43 = vld [vmem:[#allocation2 + $0x280] sm:$0xff] }
 0x17a   :  { %v232_v45 = vadd.f32 1e-05, %v230_v44  ;;  %v455_v44 = vld [vmem:[#allocation2 + $0x270] sm:$0xff] }
 0x17c   :  { %1306 = vrsqrt.f32 %v232_v45  ;;  %v454_v45 = vld [vmem:[#allocation2 + $0x260] sm:$0xff] }
 0x189   :  { %v1307_v47 = vpop.eup %1306 }
 0x18a   :  { %v234_v49 = vmul.f32 %v1307_v47, %v231_v46  ;;  %v453_v46 = vld [vmem:[#allocation2 + $0x250] sm:$0xff]  ;;  %v452_v47 = vld [vmem:[#allocation2 + $0x240] sm:$0xff] }
 0x18c   :  { %v237_v51 = vmul.f32 %v235_v48, %v234_v49  ;;  %v451_v48 = vld [vmem:[#allocation2 + $0x230] sm:$0xff]  ;;  %v450_v49 = vld [vmem:[#allocation2 + $0x220] sm:$0xff] }
 0x18e   :  { %v238_v52 = vadd.f32 %v237_v51, %v236_v50 }
 0x190   :  { %v239_v53 = vmax.f32 %v238_v52, 0.0 }
 0x192   :  { %1088 = vmatmul.mubr.f32.vlgmr.msra.gmra.mxu0 %v239_v53 }
 0x193   :  { %1157 = vmatprep.mubr.msk.f32.mxu0 %vm1365_vm3, %v1364_v0  ;;  %1126 = vmatpush3.msra.mxu0 %v465_v29  ;;  %v566_v29 = vld [vmem:[#allocation2 + $0x3d0] sm:$0xff] }
 0x194   :  { %1127 = vmatprep.subr.mxu0 %v1364_v0 }
 0x195   :  { %1128 = vmatpush3.msra.mxu0 %v464_v35  ;;  %v560_v35 = vld [vmem:[#allocation2 + $0x370] sm:$0xff] }
 0x196   :  { %1129 = vmatprep.subr.mxu0 %v1364_v0 }
 0x197   :  { %1130 = vmatpush3.msra.mxu0 %v463_v36  ;;  %v559_v36 = vld [vmem:[#allocation2 + $0x360] sm:$0xff] }
 0x198   :  { %1131 = vmatprep.subr.mxu0 %v1364_v0 }
 0x199   :  { %1132 = vmatpush3.msra.mxu0 %v462_v37 }
 0x19a   :  { %1133 = vmatprep.subr.mxu0 %v1364_v0 }
 0x19b   :  { %1134 = vmatpush3.msra.mxu0 %v461_v38  ;;  %v558_v38 = vld [vmem:[#allocation2 + $0x350] sm:$0xff] }
 0x19c   :  { %1135 = vmatprep.subr.mxu0 %v1364_v0 }
 0x19d   :  { %1136 = vmatpush3.msra.mxu0 %v460_v39 }
 0x19e   :  { %1137 = vmatprep.subr.mxu0 %v1364_v0 }
 0x19f   :  { %1138 = vmatpush3.msra.mxu0 %v459_v40  ;;  %v557_v40 = vld [vmem:[#allocation2 + $0x340] sm:$0xff] }
 0x1a0   :  { %1139 = vmatprep.subr.mxu0 %v1364_v0 }
 0x1a1   :  { %1140 = vmatpush3.msra.mxu0 %v458_v41  ;;  %v556_v41 = vld [vmem:[#allocation2 + $0x330] sm:$0xff] }
 0x1a2   :  { %1141 = vmatprep.subr.mxu0 %v1364_v0 }
 0x1a3   :  { %1142 = vmatpush3.msra.mxu0 %v457_v42  ;;  %v555_v42 = vld [vmem:[#allocation2 + $0x320] sm:$0xff] }
 0x1a4   :  { %1143 = vmatprep.subr.mxu0 %v1364_v0 }
 0x1a5   :  { %1144 = vmatpush3.msra.mxu0 %v456_v43 }
 0x1a6   :  { %1145 = vmatprep.subr.mxu0 %v1364_v0 }
 0x1a7   :  { %1146 = vmatpush3.msra.mxu0 %v455_v44 }
 0x1a8   :  { %1147 = vmatprep.subr.mxu0 %v1364_v0 }
 0x1a9   :  { %1148 = vmatpush3.msra.mxu0 %v454_v45 }
 0x1aa   :  { %1149 = vmatprep.subr.mxu0 %v1364_v0 }
 0x1ab   :  { %1150 = vmatpush3.msra.mxu0 %v453_v46 }
 0x1ac   :  { %1151 = vmatprep.subr.mxu0 %v1364_v0 }
 0x1ad   :  { %1152 = vmatpush3.msra.mxu0 %v452_v47 }
 0x1ae   :  { %1153 = vmatprep.subr.mxu0 %v1364_v0 }
 0x1af   :  { %1154 = vmatpush3.msra.mxu0 %v451_v48 }
 0x1b0   :  { %1155 = vmatprep.subr.mxu0 %v1364_v0 }
 0x1b1   :  { %1156 = vmatpush3.msra.mxu0 %v450_v49 }
 0x1b2   :  { %1195 = vmatprep.subr.mxu0 %v1364_v0 }
 0x252   :  { %v323_v55 = vpop.f32.mrf.mxu0 }
 0x253   :  { %v1441_v56 = vadd.f32 %v323_v55, %v256_v54 }
 0x254   :  { %v1089_v57 = vpop.f32.mrf.mxu0 }
 0x255   :  { %327 = vadd.xlane.f32.xlu1 %v1441_v56  ;;  %v329_v58 = vmul.f32 %v1441_v56, %v1441_v56 }
 0x259   :  { %330 = vadd.xlane.f32.xlu1 %v329_v58 }
 0x2de   :  { %v328_v13 = vpop.xlane.xlu1 %327 }
 0x2df   :  { %v332_v14 = vmul.f32 0.03125, %v328_v13  ;;  %v666_v13 = vld [vmem:[#allocation2 + $0x78] sm:$0xff] }
 0x2e1   :  { %v334_v16 = vmul.f32 %v332_v14, %v332_v14  ;;  %v336_v20 = vsub.f32 %v1441_v56, %v332_v14  ;;  %v665_v14 = vld [vmem:[#allocation2 + $0x68] sm:$0xff] }
 0x2e2   :  { %v331_v15 = vpop.xlane.xlu1 %330 }
 0x2e3   :  { %v333_v17 = vmul.f32 0.03125, %v331_v15  ;;  %v664_v15 = vld [vmem:[#allocation2 + $0x58] sm:$0xff] }
 0x2e5   :  { %v335_v18 = vsub.f32 %v333_v17, %v334_v16  ;;  %v663_v16 = vld [vmem:[#allocation2 + $0x48] sm:$0xff]  ;;  %v662_v17 = vld [vmem:[#allocation2 + $0x38] sm:$0xff] }
 0x2e7   :  { %v337_v19 = vadd.f32 1e-05, %v335_v18  ;;  %v661_v18 = vld [vmem:[#allocation2 + $0x28] sm:$0xff] }
 0x2e9   :  { %1308 = vrsqrt.f32 %v337_v19  ;;  %v660_v19 = vmax.f32 %v1413_v21, 0.0 }
 0x2f6   :  { %v1309_v22 = vpop.eup %1308 }
 0x2f7   :  { %v339_v24 = vmul.f32 %v1309_v22, %v336_v20  ;;  %v570_v20 = vld [vmem:[#allocation2 + $0x410] sm:$0xff]  ;;  %v466_v22 = vld [vmem:[#allocation4 + $0x3] ss:$0 sm:$0xff] }
 0x2f9   :  { %v342_v26 = vmul.f32 %v340_v23, %v339_v24 }
 0x2fb   :  { %v343_v27 = vadd.f32 %v342_v26, %v341_v25  ;;  %v569_v26 = vld [vmem:[#allocation2 + $0x400] sm:$0xff] }
 0x2fd   :  { %v344_v28 = vmax.f32 %v343_v27, 0.0  ;;  %v568_v27 = vld [vmem:[#allocation2 + $0x3f0] sm:$0xff] }
 0x2ff   :  { %1123 = vmatmul.mubr.f32.vlgmr.msra.gmra.mxu1 %v344_v28  ;;  %v567_v28 = vld [vmem:[#allocation2 + $0x3e0] sm:$0xff] }
 0x300   :  { %1192 = vmatprep.mubr.msk.f32.mxu1 %vm1365_vm3, %v1364_v0  ;;  %1161 = vmatpush3.msra.mxu1 %v570_v20 }
 0x301   :  { %1162 = vmatprep.subr.mxu1 %v1364_v0 }
 0x302   :  { %1163 = vmatpush3.msra.mxu1 %v569_v26  ;;  %v758_v26 = vld [vmem:[#allocation2 + $0x4b0] sm:$0xff] }
 0x303   :  { %1164 = vmatprep.subr.mxu1 %v1364_v0 }
 0x304   :  { %1165 = vmatpush3.msra.mxu1 %v568_v27  ;;  %v757_v27 = vld [vmem:[#allocation2 + $0x4a0] sm:$0xff] }
 0x305   :  { %1166 = vmatprep.subr.mxu1 %v1364_v0 }
 0x306   :  { %1167 = vmatpush3.msra.mxu1 %v567_v28  ;;  %v756_v28 = vld [vmem:[#allocation2 + $0x490] sm:$0xff] }
 0x307   :  { %1168 = vmatprep.subr.mxu1 %v1364_v0 }
 0x308   :  { %1169 = vmatpush3.msra.mxu1 %v566_v29  ;;  %v755_v29 = vld [vmem:[#allocation2 + $0x480] sm:$0xff] }
 0x309   :  { %1170 = vmatprep.subr.mxu1 %v1364_v0 }
 0x3bf   :  { %v428_v31 = vpop.f32.mrf.mxu1 }
 0x3c0   :  { %v429_v32 = vadd.f32 %v428_v31, %v361_v30  ;;  %v565_v30 = vld [vmem:[#allocation2 + $0x3c0] sm:$0xff]  ;;  %v564_v31 = vld [vmem:[#allocation2 + $0x3b0] sm:$0xff] }
 0x3c1   :  { %v1124_v33 = vpop.f32.mrf.mxu1  ;;  %1171 = vmatpush3.msra.mxu1 %v565_v30  ;;  %v754_v30 = vld [vmem:[#allocation2 + $0x470] sm:$0xff] }
 0x3c2   :  { %432 = vadd.xlane.f32.xlu0 %v429_v32  ;;  %v434_v34 = vmul.f32 %v429_v32, %v429_v32  ;;  %1172 = vmatprep.subr.mxu1 %v1364_v0  ;;  %v562_v33 = vld [vmem:[#allocation2 + $0x390] sm:$0xff] }
 0x3c3   :  { %1173 = vmatpush3.msra.mxu1 %v564_v31 }
 0x3c4   :  { %435 = vadd.xlane.f32.xlu1 %v434_v34  ;;  %1174 = vmatprep.subr.mxu1 %v1364_v0  ;;  %v561_v34 = vld [vmem:[#allocation2 + $0x380] sm:$0xff] }
 0x44b   :  { %v433_v50 = vpop.xlane.xlu0 %432 }
 0x44c   :  { %v437_v51 = vmul.f32 0.03125, %v433_v50 }
 0x44d   :  { %v436_v52 = vpop.xlane.xlu1 %435 }
 0x44e   :  { %v439_v53 = vmul.f32 %v437_v51, %v437_v51  ;;  %v438_v54 = vmul.f32 0.03125, %v436_v52  ;;  %v441_v57 = vsub.f32 %v429_v32, %v437_v51  ;;  %v563_v32 = vld [vmem:[#allocation2 + $0x3a0] sm:$0xff]  ;;  %v550_v52 = vld [vmem:[#allocation4 + $0x11] ss:$0 sm:$0xff] }
 0x44f   :  { %1175 = vmatpush3.msra.mxu1 %v563_v32  ;;  %v753_v32 = vld [vmem:[#allocation2 + $0x460] sm:$0xff] }
 0x450   :  { %v440_v55 = vsub.f32 %v438_v54, %v439_v53  ;;  %1176 = vmatprep.subr.mxu1 %v1364_v0  ;;  %v551_v54 = vld [vmem:[#allocation4 + $0x16] ss:$0 sm:$0xff] }
 0x451   :  { %1177 = vmatpush3.msra.mxu1 %v562_v33 }
 0x452   :  { %v442_v56 = vadd.f32 1e-05, %v440_v55  ;;  %1178 = vmatprep.subr.mxu1 %v1364_v0 }
 0x453   :  { %1179 = vmatpush3.msra.mxu1 %v561_v34  ;;  %v752_v34 = vld [vmem:[#allocation2 + $0x450] sm:$0xff] }
 0x454   :  { %1310 = vrsqrt.f32 %v442_v56  ;;  %1180 = vmatprep.subr.mxu1 %v1364_v0 }
 0x455   :  { %1181 = vmatpush3.msra.mxu1 %v560_v35  ;;  %v751_v35 = vld [vmem:[#allocation2 + $0x440] sm:$0xff] }
 0x456   :  { %1182 = vmatprep.subr.mxu1 %v1364_v0 }
 0x457   :  { %1183 = vmatpush3.msra.mxu1 %v559_v36  ;;  %v750_v36 = vld [vmem:[#allocation2 + $0x430] sm:$0xff] }
 0x458   :  { %1184 = vmatprep.subr.mxu1 %v1364_v0 }
 0x459   :  { %1185 = vmatpush3.msra.mxu1 %v558_v38 }
 0x45a   :  { %1186 = vmatprep.subr.mxu1 %v1364_v0 }
 0x45b   :  { %1187 = vmatpush3.msra.mxu1 %v557_v40 }
 0x45c   :  { %1188 = vmatprep.subr.mxu1 %v1364_v0 }
 0x45d   :  { %1189 = vmatpush3.msra.mxu1 %v556_v41 }
 0x45e   :  { %1190 = vmatprep.subr.mxu1 %v1364_v0 }
 0x45f   :  { %1191 = vmatpush3.msra.mxu1 %v555_v42 }
 0x460   :  { %1230 = vmatprep.subr.mxu1 %v1364_v0 }
 0x461   :  { %v1311_v58 = vpop.eup %1310 }
 0x462   :  { %v444_v60 = vmul.f32 %v1311_v58, %v441_v57  ;;  %v780_v58 = vld [vmem:[#allocation2 + $0x610] sm:$0xff] }
 0x464   :  { %v447_v62 = vmul.f32 %v445_v59, %v444_v60  ;;  %v779_v59 = vld [vmem:[#allocation2 + $0x600] sm:$0xff]  ;;  %v778_v60 = vld [vmem:[#allocation2 + $0x5f0] sm:$0xff] }
 0x466   :  { %v448_v63 = vadd.f32 %v447_v62, %v446_v61  ;;  %v777_v61 = vld [vmem:[#allocation2 + $0x5e0] sm:$0xff]  ;;  %v776_v62 = vld [vmem:[#allocation2 + $0x5d0] sm:$0xff] }
 0x468   :  { %v449_v1 = vmax.f32 %v448_v63, 0.0  ;;  %v775_v63 = vld [vmem:[#allocation2 + $0x5c0] sm:$0xff] }
 0x46a   :  { %1158 = vmatmul.mubr.f32.vlgmr.msra.gmra.mxu0 %v449_v1  ;;  %v774_v1 = vld [vmem:[#allocation2 + $0x5b0] sm:$0xff] }
 0x46b   :  { %1196 = vmatpush3.msra.mxu0 %v676_v2  ;;  %1227 = vmatprep.mubr.msk.f32.mxu0 %vm1365_vm3, %v1364_v0  ;;  %v773_v2 = vld [vmem:[#allocation2 + $0x5a0] sm:$0xff] }
 0x46c   :  { %1197 = vmatprep.subr.mxu0 %v1364_v0 }
 0x46d   :  { %1198 = vmatpush3.msra.mxu0 %v675_v3  ;;  %v772_v3 = vld [vmem:[#allocation2 + $0x590] sm:$0xff] }
 0x46e   :  { %1199 = vmatprep.subr.mxu0 %v1364_v0 }
 0x46f   :  { %1200 = vmatpush3.msra.mxu0 %v674_v4  ;;  %v771_v4 = vld [vmem:[#allocation2 + $0x580] sm:$0xff] }
 0x470   :  { %1201 = vmatprep.subr.mxu0 %v1364_v0 }
 0x471   :  { %1202 = vmatpush3.msra.mxu0 %v673_v5  ;;  %v770_v5 = vld [vmem:[#allocation2 + $0x570] sm:$0xff] }
 0x472   :  { %1203 = vmatprep.subr.mxu0 %v1364_v0 }
 0x473   :  { %1204 = vmatpush3.msra.mxu0 %v672_v7  ;;  %v769_v7 = vld [vmem:[#allocation2 + $0x560] sm:$0xff] }
 0x474   :  { %1205 = vmatprep.subr.mxu0 %v1364_v0 }
 0x475   :  { %1206 = vmatpush3.msra.mxu0 %v671_v8  ;;  %v768_v8 = vld [vmem:[#allocation2 + $0x550] sm:$0xff] }
 0x476   :  { %1207 = vmatprep.subr.mxu0 %v1364_v0 }
 0x477   :  { %1208 = vmatpush3.msra.mxu0 %v670_v9  ;;  %v677_v9 = vld [vmem:[#allocation4 + $0x9] ss:$0 sm:$0xff] }
 0x478   :  { %1209 = vmatprep.subr.mxu0 %v1364_v0 }
 0x479   :  { %1210 = vmatpush3.msra.mxu0 %v669_v10  ;;  %v767_v10 = vld [vmem:[#allocation2 + $0x540] sm:$0xff] }
 0x47a   :  { %1211 = vmatprep.subr.mxu0 %v1364_v0 }
 0x47b   :  { %1212 = vmatpush3.msra.mxu0 %v668_v11 }
 0x47c   :  { %1213 = vmatprep.subr.mxu0 %v1364_v0 }
 0x47d   :  { %1214 = vmatpush3.msra.mxu0 %v667_v12  ;;  %v766_v12 = vld [vmem:[#allocation2 + $0x530] sm:$0xff] }
 0x47e   :  { %1215 = vmatprep.subr.mxu0 %v1364_v0 }
 0x47f   :  { %1216 = vmatpush3.msra.mxu0 %v666_v13  ;;  %v765_v13 = vld [vmem:[#allocation2 + $0x520] sm:$0xff] }
 0x480   :  { %1217 = vmatprep.subr.mxu0 %v1364_v0 }
 0x481   :  { %1218 = vmatpush3.msra.mxu0 %v665_v14 }
 0x482   :  { %1219 = vmatprep.subr.mxu0 %v1364_v0 }
 0x483   :  { %1220 = vmatpush3.msra.mxu0 %v664_v15  ;;  %v764_v15 = vld [vmem:[#allocation2 + $0x510] sm:$0xff] }
 0x484   :  { %1221 = vmatprep.subr.mxu0 %v1364_v0 }
 0x485   :  { %1222 = vmatpush3.msra.mxu0 %v663_v16  ;;  %v571_v16 = vld [vmem:[#allocation4 + $0x4] ss:$0 sm:$0xff] }
 0x486   :  { %1223 = vmatprep.subr.mxu0 %v1364_v0 }
 0x487   :  { %1224 = vmatpush3.msra.mxu0 %v662_v17 }
 0x488   :  { %1225 = vmatprep.subr.mxu0 %v1364_v0 }
 0x489   :  { %1226 = vmatpush3.msra.mxu0 %v661_v18 }
 0x48a   :  { %1228 = vmatmul.mubr.f32.vlgmr.msra.gmra.mxu0 %v660_v19  ;;  %1265 = vmatprep.subr.mxu0 %v1364_v0 }
 0x48b   :  { %1297 = vmatprep.mubr.msk.f32.mxu0 %vm1365_vm3, %v1364_v0  ;;  %1266 = vmatpush3.msra.mxu0 %v764_v15 }
 0x48c   :  { %1267 = vmatprep.subr.mxu0 %v1364_v0 }
 0x52a   :  { %v533_v23 = vpop.f32.mrf.mxu0 }
 0x52b   :  { %v1503_v24 = vadd.f32 %v533_v23, %v466_v22  ;;  %v763_v22 = vld [vmem:[#allocation2 + $0x500] sm:$0xff]  ;;  %v762_v23 = vld [vmem:[#allocation2 + $0x4f0] sm:$0xff] }
 0x52c   :  { %v1159_v25 = vpop.f32.mrf.mxu0  ;;  %1268 = vmatpush3.msra.mxu0 %v763_v22 }
 0x52d   :  { %537 = vadd.xlane.f32.xlu0 %v1503_v24  ;;  %v539_v21 = vmul.f32 %v1503_v24, %v1503_v24  ;;  %1269 = vmatprep.subr.mxu0 %v1364_v0  ;;  %v760_v25 = vld [vmem:[#allocation2 + $0x4d0] sm:$0xff] }
 0x52e   :  { %1270 = vmatpush3.msra.mxu0 %v762_v23 }
 0x52f   :  { %540 = vadd.xlane.f32.xlu1 %v539_v21  ;;  %1271 = vmatprep.subr.mxu0 %v1364_v0  ;;  %v759_v21 = vld [vmem:[#allocation2 + $0x4c0] sm:$0xff] }
 0x54a   :  { %v1517_v37 = vpop.f32.mrf.mxu0 }
 0x54b   :  { %v745_v11 = vadd.f32 %v1517_v37, %v677_v9  ;;  %v749_v37 = vld [vmem:[#allocation2 + $0x420] sm:$0xff] }
 0x54c   :  { %v1229_v39 = vpop.f32.mrf.mxu0 }
 0x54d   :  { %v748_v14 = vmax.f32 %v745_v11, 0.0 }
 0x5b6   :  { %v538_v43 = vpop.xlane.xlu0 %537 }
 0x5b7   :  { %v542_v44 = vmul.f32 0.03125, %v538_v43 }
 0x5b8   :  { %v541_v45 = vpop.xlane.xlu1 %540 }
 0x5b9   :  { %v544_v46 = vmul.f32 %v542_v44, %v542_v44  ;;  %v543_v47 = vmul.f32 0.03125, %v541_v45  ;;  %v546_v50 = vsub.f32 %v1503_v24, %v542_v44  ;;  %v761_v24 = vld [vmem:[#allocation2 + $0x4e0] sm:$0xff] }
 0x5ba   :  { %1272 = vmatpush3.msra.mxu0 %v761_v24 }
 0x5bb   :  { %v545_v48 = vsub.f32 %v543_v47, %v544_v46  ;;  %1273 = vmatprep.subr.mxu0 %v1364_v0  ;;  %v655_v47 = vld [vmem:[#allocation4 + $0x12] ss:$0 sm:$0xff] }
 0x5bc   :  { %1274 = vmatpush3.msra.mxu0 %v760_v25 }
 0x5bd   :  { %v547_v49 = vadd.f32 1e-05, %v545_v48  ;;  %1275 = vmatprep.subr.mxu0 %v1364_v0 }
 0x5be   :  { %1276 = vmatpush3.msra.mxu0 %v759_v21 }
 0x5bf   :  { %1312 = vrsqrt.f32 %v547_v49  ;;  %1277 = vmatprep.subr.mxu0 %v1364_v0  ;;  %v656_v49 = vld [vmem:[#allocation4 + $0x17] ss:$0 sm:$0xff] }
 0x5c0   :  { %1278 = vmatpush3.msra.mxu0 %v758_v26 }
 0x5c1   :  { %1279 = vmatprep.subr.mxu0 %v1364_v0 }
 0x5c2   :  { %1280 = vmatpush3.msra.mxu0 %v757_v27 }
 0x5c3   :  { %1281 = vmatprep.subr.mxu0 %v1364_v0 }
 0x5c4   :  { %1282 = vmatpush3.msra.mxu0 %v756_v28 }
 0x5c5   :  { %1283 = vmatprep.subr.mxu0 %v1364_v0 }
 0x5c6   :  { %1284 = vmatpush3.msra.mxu0 %v755_v29 }
 0x5c7   :  { %1285 = vmatprep.subr.mxu0 %v1364_v0 }
 0x5c8   :  { %1286 = vmatpush3.msra.mxu0 %v754_v30 }
 0x5c9   :  { %1287 = vmatprep.subr.mxu0 %v1364_v0 }
 0x5ca   :  { %1288 = vmatpush3.msra.mxu0 %v753_v32 }
 0x5cb   :  { %1289 = vmatprep.subr.mxu0 %v1364_v0 }
 0x5cc   :  { %v1313_v51 = vpop.eup %1312  ;;  %1290 = vmatpush3.msra.mxu0 %v752_v34 }
 0x5cd   :  { %v549_v53 = vmul.f32 %v1313_v51, %v546_v50  ;;  %1291 = vmatprep.subr.mxu0 %v1364_v0 }
 0x5ce   :  { %1292 = vmatpush3.msra.mxu0 %v751_v35 }
 0x5cf   :  { %v552_v55 = vmul.f32 %v550_v52, %v549_v53  ;;  %1293 = vmatprep.subr.mxu0 %v1364_v0  ;;  %v921_v53 = vld [vmem:[#allocation4 + $0x5] ss:$0 sm:$0xff] }
 0x5d0   :  { %1294 = vmatpush3.msra.mxu0 %v750_v36 }
 0x5d1   :  { %v553_v56 = vadd.f32 %v552_v55, %v551_v54  ;;  %1295 = vmatprep.subr.mxu0 %v1364_v0 }
 0x5d2   :  { %1296 = vmatpush3.msra.mxu0 %v749_v37 }
 0x5d3   :  { %v554_v57 = vmax.f32 %v553_v56, 0.0 }
 0x5d5   :  { %1193 = vmatmul.mubr.f32.vlgmr.msra.gmra.mxu1 %v554_v57 }
 0x5d6   :  { %1231 = vmatpush3.msra.mxu1 %v780_v58  ;;  %1262 = vmatprep.mubr.msk.f32.mxu1 %vm1365_vm3, %v1364_v0 }
 0x5d7   :  { %1232 = vmatprep.subr.mxu1 %v1364_v0 }
 0x5d8   :  { %1233 = vmatpush3.msra.mxu1 %v779_v59 }
 0x5d9   :  { %1234 = vmatprep.subr.mxu1 %v1364_v0 }
 0x5da   :  { %1235 = vmatpush3.msra.mxu1 %v778_v60 }
 0x5db   :  { %1236 = vmatprep.subr.mxu1 %v1364_v0 }
 0x5dc   :  { %1237 = vmatpush3.msra.mxu1 %v777_v61 }
 0x5dd   :  { %1238 = vmatprep.subr.mxu1 %v1364_v0 }
 0x5de   :  { %1239 = vmatpush3.msra.mxu1 %v776_v62 }
 0x5df   :  { %1240 = vmatprep.subr.mxu1 %v1364_v0 }
 0x5e0   :  { %1241 = vmatpush3.msra.mxu1 %v775_v63 }
 0x5e1   :  { %1242 = vmatprep.subr.mxu1 %v1364_v0 }
 0x5e2   :  { %1243 = vmatpush3.msra.mxu1 %v774_v1 }
 0x5e3   :  { %1244 = vmatprep.subr.mxu1 %v1364_v0 }
 0x5e4   :  { %1245 = vmatpush3.msra.mxu1 %v773_v2 }
 0x5e5   :  { %1246 = vmatprep.subr.mxu1 %v1364_v0 }
 0x5e6   :  { %1247 = vmatpush3.msra.mxu1 %v772_v3 }
 0x5e7   :  { %1248 = vmatprep.subr.mxu1 %v1364_v0 }
 0x5e8   :  { %1249 = vmatpush3.msra.mxu1 %v771_v4 }
 0x5e9   :  { %1250 = vmatprep.subr.mxu1 %v1364_v0 }
 0x5ea   :  { %1251 = vmatpush3.msra.mxu1 %v770_v5 }
 0x5eb   :  { %1252 = vmatprep.subr.mxu1 %v1364_v0 }
 0x5ec   :  { %1253 = vmatpush3.msra.mxu1 %v769_v7 }
 0x5ed   :  { %1254 = vmatprep.subr.mxu1 %v1364_v0 }
 0x5ee   :  { %1255 = vmatpush3.msra.mxu1 %v768_v8 }
 0x5ef   :  { %1256 = vmatprep.subr.mxu1 %v1364_v0 }
 0x5f0   :  { %1257 = vmatpush3.msra.mxu1 %v767_v10 }
 0x5f1   :  { %1258 = vmatprep.subr.mxu1 %v1364_v0 }
 0x5f2   :  { %1259 = vmatpush3.msra.mxu1 %v766_v12 }
 0x5f3   :  { %1260 = vmatprep.subr.mxu1 %v1364_v0 }
 0x5f4   :  { %1261 = vmatpush3.msra.mxu1 %v765_v13 }
 0x5f5   :  { %1263 = vmatmul.mubr.f32.vlgmr.msra.gmra.mxu1 %v748_v14 }
 0x695   :  { %v638_v17 = vpop.f32.mrf.mxu1 }
 0x696   :  { %v1545_v18 = vadd.f32 %v638_v17, %v571_v16 }
 0x697   :  { %v1194_v19 = vpop.f32.mrf.mxu1 }
 0x698   :  { %642 = vadd.xlane.f32.xlu0 %v1545_v18  ;;  %v644_v20 = vmul.f32 %v1545_v18, %v1545_v18 }
 0x69a   :  { %645 = vadd.xlane.f32.xlu1 %v644_v20 }
 0x6b5   :  { %v847_v31 = vpop.f32.mrf.mxu1 }
 0x6b7   :  { %v1264_v33 = vpop.f32.mrf.mxu1 }
 0x721   :  { %v643_v38 = vpop.xlane.xlu0 %642 }
 0x722   :  { %v647_v39 = vmul.f32 0.03125, %v643_v38 }
 0x723   :  { %v646_v40 = vpop.xlane.xlu1 %645 }
 0x724   :  { %v649_v41 = vmul.f32 %v647_v39, %v647_v39  ;;  %v648_v42 = vmul.f32 0.03125, %v646_v40  ;;  %v651_v45 = vsub.f32 %v1545_v18, %v647_v39 }
 0x726   :  { %v650_v43 = vsub.f32 %v648_v42, %v649_v41 }
 0x728   :  { %v652_v44 = vadd.f32 1e-05, %v650_v43 }
 0x72a   :  { %1314 = vrsqrt.f32 %v652_v44 }
 0x737   :  { %v1315_v46 = vpop.eup %1314 }
 0x738   :  { %v654_v48 = vmul.f32 %v1315_v46, %v651_v45 }
 0x73a   :  { %v657_v50 = vmul.f32 %v655_v47, %v654_v48 }
 0x73c   :  { %v658_v51 = vadd.f32 %v657_v50, %v656_v49 }
 0x73e   :  { %v659_v52 = vmax.f32 %v658_v51, 0.0 }
 0x740   :  { %1298 = vmatmul.mubr.f32.vlgmr.msra.gmra.mxu0 %v659_v52 }
 0x800   :  { %v917_v0 = vpop.f32.mrf.mxu0 }
 0x801   :  { %v918_v54 = vadd.f32 %v917_v0, %v847_v31 }
 0x802   :  { %v1299_v55 = vpop.f32.mrf.mxu0 }
 0x803   :  { %v922_v56 = vadd.f32 %v921_v53, %v918_v54 }
 0x805   :  { %923 = vst [vmem:[%s1577_s4] sm:$0xff] %v922_v56  ;;  %v924_v57 = vadd.f32 %v922_v56, %v1406_v6 }
 0x807   :  { %925 = vst.msk [vmem:[%s1577_s4] sm:$0xff] %vm133_vm2, %v924_v57 }
 0x808   :  { %930 = vsyncpa [#allocation3], 1 }
 0x809   :  { %931 = vsyncpa [#allocation5], 1 }

</bundles_post_ra>
